<compile_context>
chip_gen: v7x
topology: tpu7x:2x2x1
jax: 0.10.0
libtpu: 0.0.40
codegen_flags: <defaults>
</compile_context>

<pallas_src>
import jax
import jax.numpy as jnp
from jax.experimental import pallas as pl
from jax.experimental.pallas import tpu as pltpu


def _chip_flavor():
    """Best-effort chip detection at trace time. Returns (is_v5e, is_v7x)."""
    try:
        kind = jax.devices()[0].device_kind.lower()
    except Exception:
        return False, False
    is_v5e = ("v5 lite" in kind) or ("v5e" in kind) or ("v5litepod" in kind)
    is_v7x = ("v7" in kind) or ("tpu7" in kind) or ("tpu 7" in kind)
    return is_v5e, is_v7x


def _make_silu_kernel(compute_dtype=None):
    """compute_dtype=None -> compute in the input dtype (v6e/v7x have native
    bf16 VPU/EUP); pass jnp.float32 for bf16/fp16 inputs on v5e."""

    def _silu_kernel(x_ref, o_ref):
        x = x_ref[...]
        if compute_dtype is not None and x.dtype != compute_dtype:
            x = x.astype(compute_dtype)
        # silu(x) = x * sigmoid(x) = 0.5 * x * (tanh(x/2) + 1)
        # -> exactly one EUP transcendental per element, rest is VPU mul/add.
        y = 0.5 * x * (jnp.tanh(0.5 * x) + 1.0)
        o_ref[...] = y.astype(o_ref.dtype)

    return _silu_kernel


def silu_pallas(
    x: jax.Array,
    *,
    target_block_bytes: int | None = None,
    compute_dtype=None,
) -> jax.Array:
    """Elementwise SiLU via Pallas. Matches torch.nn.functional.silu semantics."""
    orig_shape = x.shape
    dtype = x.dtype
    n = x.size
    if n == 0:
        return x

    is_v5e, is_v7x = _chip_flavor()

    # Per-generation defaults.
    if target_block_bytes is None:
        target_block_bytes = (4 if is_v7x else 2) * 1024 * 1024
    if compute_dtype is None and is_v5e and dtype in (jnp.bfloat16, jnp.float16):
        # v5e has no bf16 VPU/EUP path; upcast for correctness + clean lowering.
        compute_dtype = jnp.float32

    lanes = 128
    itemsize = jnp.dtype(dtype).itemsize
    # Sublane packing granularity: 8 (f32), 16 (bf16), 32 (int8/fp8).
    sub = max(8, 32 // itemsize)

    x_flat = jnp.ravel(x)
    rem = n % lanes
    bulk = n - rem

    def _silu_small(v):
        v32 = v.astype(jnp.float32)
        return (v32 * jax.nn.sigmoid(v32)).astype(dtype)

    if bulk == 0:
        # <128 elements: not worth a kernel launch; plain jnp fallback.
        return _silu_small(x_flat).reshape(orig_shape)

    rows = bulk // lanes
    x2d = x_flat[:bulk].reshape(rows, lanes)  # free, lane-aligned view

    # ---- Block sizing -------------------------------------------------------
    max_rows = max(sub, (target_block_bytes // (lanes * itemsize)) // sub * sub)

    if rows <= sub:
        # Single full-dim block; no (8,128) divisibility needed.
        block_rows = rows
    elif is_v7x:
        # Two TensorCores: keep the 1-D "parallel" grid balanced.
        if rows <= 2 * max_rows:
            # Two near-equal halves.
            block_rows = pl.cdiv(pl.cdiv(rows, 2), sub) * sub
        else:
            block_rows = max_rows
            n_blk = pl.cdiv(rows, block_rows)
            if n_blk % 2 != 0:
                # Shrink blocks slightly to an even, near-equal split.
                n_blk += 1
                block_rows = min(max_rows, pl.cdiv(pl.cdiv(rows, n_blk), sub) * sub)
    else:
        # Single-TC chips (v5e/v6e): one block up to target_block_bytes,
        # no artificial extra grid steps.
        block_rows = rows if rows <= max_rows else max_rows

    n_blocks = pl.cdiv(rows, block_rows)

    cost = pl.CostEstimate(
        flops=4 * bulk,
        transcendentals=bulk,
        bytes_accessed=2 * bulk * itemsize,
    )

    out2d = pl.pallas_call(
        _make_silu_kernel(compute_dtype=compute_dtype),
        out_shape=jax.ShapeDtypeStruct((rows, lanes), dtype),
        grid_spec=pltpu.PrefetchScalarGridSpec(
            num_scalar_prefetch=0,
            grid=(n_blocks,),
            in_specs=[pl.BlockSpec((block_rows, lanes), lambda i: (i, 0))],
            out_specs=pl.BlockSpec((block_rows, lanes), lambda i: (i, 0)),
        ),
        compiler_params=pltpu.CompilerParams(
            dimension_semantics=("parallel",),
            vmem_limit_bytes=32 * 1024 * 1024,
        ),
        cost_estimate=cost,
    )(x2d)

    out_flat = out2d.reshape(-1)
    if rem != 0:
        # Lane-ragged tail (<=127 elems): plain jnp, then concatenate.
        # TODO(synk): fold the tail into the last block via a scalar-prefetched
        # valid length + masked store to avoid the concat copy entirely.
        tail_out = _silu_small(x_flat[bulk:])
        out_flat = jnp.concatenate([out_flat, tail_out])
    return out_flat.reshape(orig_shape)


if __name__ == "__main__":
    key = jax.random.PRNGKey(0)
    # NCHW input, consistent with typical PyTorch usage.
    x = jax.random.normal(key, (2, 4, 16, 16), dtype=jnp.float32)

    y = silu_pallas(x)
    y = jax.block_until_ready(y)

    # Reference check against plain JAX SiLU.
    y_ref = x * jax.nn.sigmoid(x)
    assert y.shape == x.shape and y.dtype == x.dtype
    assert jnp.allclose(y, y_ref, atol=1e-5, rtol=1e-5)

    print("KERNEL_OK")
</pallas_src>

<mosaic_0001>
module attributes {stable_mosaic.version = 11 : i64} {
  func.func @_silu_kernel(%arg0: i32, %arg1: memref<16x128xf32, #tpu.memory_space<vmem>>, %arg2: memref<16x128xf32, #tpu.memory_space<vmem>>) attributes {dimension_semantics = [#tpu.dimension_semantics<parallel>], iteration_bounds = array<i64: 1>, scalar_prefetch = 0 : i64, scratch_operands = 0 : i64, tpu.core_type = #tpu.core_type<tc>, window_params = [{transform_indices = @transform_0, window_bounds = array<i64: 16, 128>}, {transform_indices = @transform_1, window_bounds = array<i64: 16, 128>}]} {
    %c0 = arith.constant 0 : index
    %c0_0 = arith.constant 0 : index
    %0 = vector.load %arg1[%c0, %c0_0] : memref<16x128xf32, #tpu.memory_space<vmem>>, vector<16x128xf32>
    %cst = arith.constant 5.000000e-01 : f32
    %1 = vector.broadcast %cst : f32 to vector<16x128xf32>
    %2 = arith.mulf %1, %0 : vector<16x128xf32>
    %cst_1 = arith.constant 5.000000e-01 : f32
    %3 = vector.broadcast %cst_1 : f32 to vector<16x128xf32>
    %4 = arith.mulf %3, %0 : vector<16x128xf32>
    %5 = math.tanh %4 : vector<16x128xf32>
    %cst_2 = arith.constant 1.000000e+00 : f32
    %6 = vector.broadcast %cst_2 : f32 to vector<16x128xf32>
    %7 = arith.addf %5, %6 : vector<16x128xf32>
    %8 = arith.mulf %2, %7 : vector<16x128xf32>
    %c0_3 = arith.constant 0 : index
    %c0_4 = arith.constant 0 : index
    %9 = vector.load %arg2[%c0_3, %c0_4] : memref<16x128xf32, #tpu.memory_space<vmem>>, vector<16x128xf32>
    tpu.vector_store %arg2[%c0_3, %c0_4], %8 {strides = array<i32>} : memref<16x128xf32, #tpu.memory_space<vmem>>, vector<16x128xf32>,
    return
  }
  func.func @transform_0(%arg0: i32) -> (i32, i32) {
    %c0_i32 = arith.constant 0 : i32
    %c0_i32_0 = arith.constant 0 : i32
    return %arg0, %c0_i32 : i32, i32
  }
  func.func @transform_1(%arg0: i32) -> (i32, i32) {
    %c0_i32 = arith.constant 0 : i32
    %c0_i32_0 = arith.constant 0 : i32
    return %arg0, %c0_i32 : i32, i32
  }
}

</mosaic_0001>

<bundles_post_ra>
// kernel: tpu_custom_call.1
= control target key start
LH: loop header
LB: loop body
LE: loop exit
PB: predicated region body
PF: predicated region fallthrough
CT: control target
= control target key end

     0   :  { %6 = vsyncpa [#allocation3], 0  ;;  %s152_s0 = inlined_call_operand.hbm [shape: f32[16,128], index: 0, kind: input, shape index: {}]   ;;  %s153_s1 = inlined_call_operand.hbm [shape: f32[16,128], index: 1, kind: output, shape index: {}]  }
   0x1   :  { %7 = vsyncpa [#allocation4], 0  ;;  %s108_s6 = smov [#allocation2]   ;;  %s60_s10 = scalar_lea.hbm %s152_s0, 256 }
   0x2   :  { %s13_s7 = sshll.u32 %s108_s6, 4  ;;  %p61_p0 = scmp.ne.s32.totalorder %s152_s0, %s60_s10  ;;  %s14_s7 = int_to_ptr.vmem [resolvable:$true] %s13_s7 }
   0x3   :  { %p64_p1 = scmp.lt.u32.totalorder %s60_s10, %s152_s0 }
   0x5   :  { %p66_p2 = pnand %p64_p1, %p61_p0 }
   0x7   :  { %69 = shalt.err (!%p66_p2)
}
   0x8   :  { %s70_s15 = scalar_lea.vmem %s14_s7, 256  ;;  %p75_p4 = scmp.lt.s32.totalorder %s14_s7, %s14_s7 }
   0x9   :  { %p71_p3 = scmp.ne.s32.totalorder %s14_s7, %s70_s15  ;;  %p76_p5 = scmp.lt.s32.totalorder %s70_s15, %s70_s15 }
   0xb   :  { %p77_p6 = por %p76_p5, %p75_p4 }
   0xd   :  { %p78_p7 = pnand %p77_p6, %p71_p3 }
   0xf   :  { %81 = shalt.err (!%p78_p7)
}
  0x10   :  { %s109_s16 = smov 128   ;;  %s110_s17 = smov 8  }
  0x11   :  { %19 = dma.hbm_to_vmem [thread:$0]  %s152_s0, 256, %s14_s7, [#allocation3], %s109_s16, %s109_s16, %s110_s17  }
  0x12   :  { %104 = dma.done.wait [#allocation3], 256  }
  0x13   :  { %105 = vsyncadd [#allocation3], 4294967040  ;;  %v23_v0 = vld [vmem:[#allocation2] sm:$0xff]  ;;  %v24_v1 = vld [vmem:[#allocation2 + $0x8] sm:$0xff]  ;;  %s111_s20 = smov [#allocation5]  }
  0x14   :  { %v25_v2 = vmul.f32 0.5, %v23_v0  ;;  %v26_v3 = vmul.f32 0.5, %v24_v1  ;;  %s40_s21 = sshll.u32 %s111_s20, 4  ;;  %s41_s21 = int_to_ptr.vmem [resolvable:$true] %s40_s21 }
  0x15   :  { %s82_s0 = scalar_lea.vmem %s41_s21, 256  ;;  %p87_p9 = scmp.lt.s32.totalorder %s41_s21, %s41_s21 }
  0x16   :  { %56 = vtanh.f32 %v25_v2  ;;  %p83_p8 = scmp.ne.s32.totalorder %s41_s21, %s82_s0  ;;  %p88_p10 = scmp.lt.s32.totalorder %s82_s0, %s82_s0 }
  0x17   :  { %58 = vtanh.f32 %v26_v3 }
  0x18   :  { %p89_p11 = por %p88_p10, %p87_p9 }
  0x1a   :  { %p90_p12 = pnand %p89_p11, %p83_p8 }
  0x20   :  { %v57_v4 = vpop.eup %56 }
  0x21   :  { %v59_v5 = vpop.eup %58  ;;  %v29_v6 = vadd.f32 1.0, %v57_v4 }
  0x22   :  { %v30_v7 = vadd.f32 1.0, %v59_v5 }
  0x23   :  { %v31_v8 = vmul.f32 %v29_v6, %v25_v2 }
  0x24   :  { %v32_v9 = vmul.f32 %v30_v7, %v26_v3 }
  0x25   :  { %33 = vst [vmem:[#allocation5] sm:$0xff] %v31_v8 }
  0x26   :  { %34 = vst [vmem:[#allocation5 + $0x8] sm:$0xff] %v32_v9 }
  0x27   :  { %93 = shalt.err (!%p90_p12)
}
  0x28   :  { %s94_s24 = scalar_lea.hbm %s153_s1, 256 }
  0x29   :  { %p95_p13 = scmp.ne.s32.totalorder %s153_s1, %s94_s24  ;;  %p98_p0 = scmp.lt.u32.totalorder %s94_s24, %s153_s1 }
  0x2b   :  { %p100_p1 = pnand %p98_p0, %p95_p13 }
  0x2d   :  { %103 = shalt.err (!%p100_p1)
}
  0x2e   :  { %46 = dma.vmem_to_hbm [thread:$0]  %s41_s21, 256, %s153_s1, [#allocation4], %s109_s16, %s109_s16, %s110_s17  }
  0x2f   :  { %106 = dma.done.wait [#allocation4], 256  }
  0x30   :  { %107 = vsyncadd [#allocation4], 4294967040 }
  0x31   :  { %50 = vsyncpa [#allocation3], 1 }
  0x32   :  { %51 = vsyncpa [#allocation4], 1 }

</bundles_post_ra>
